<compile_context>
chip_gen: v6e
topology: v6e:2x2x1
jax: 0.10.0
libtpu: 0.0.40
codegen_flags: <defaults>
</compile_context>

<pallas_src>
import functools

import jax
import jax.numpy as jnp
from jax.experimental import pallas as pl
from jax.experimental.pallas import tpu as pltpu

_BN_EPS = 1e-5
_LANE = 128


def _pad_to(n, m):
    return ((n + m - 1) // m) * m


def _epilogue_dtype():
    """bf16 BN/ReLU epilogue on v6e/v7x (bf16-native VPU), f32 otherwise (v5e)."""
    kind = jax.devices()[0].device_kind.lower()
    if "v6" in kind or "v7" in kind:
        return jnp.bfloat16
    return jnp.float32


def _fused_fc_rafa_kernel(x_ref, w_ref, gb_ref, o_ref, *, epilogue_dtype):
    """Whole FC_rAFA forward, fused, VMEM/vreg resident.

    x_ref : (B, P)     bf16  flattened + zero-padded input
    w_ref : (4, P, P)  bf16  w1..w4 stored (in, out), zero-padded
    gb_ref: (4, 2, P)  f32   layers 0..2: rows [gamma, beta]; layer 3: [bias, 0]
    o_ref : (B, P)     f32   padded logits
    """
    inv_b = 1.0 / x_ref.shape[0]

    def bn_relu(y, layer):
        gb = gb_ref[layer]                                   # one load, index in-vreg
        gamma = gb[0:1, :]
        beta = gb[1:2, :]
        # Single-pass stats: the two reductions are independent XLU ops.
        mean = jnp.sum(y, axis=0, keepdims=True) * inv_b
        ex2 = jnp.sum(y * y, axis=0, keepdims=True) * inv_b
        var = ex2 - mean * mean
        scale = gamma * jax.lax.rsqrt(var + _BN_EPS)         # rsqrt -> EUP (idle slot)
        shift = beta - mean * scale
        # Fused multiply-add + ReLU in the chip-appropriate dtype.
        y_e = y.astype(epilogue_dtype)
        h = jnp.maximum(y_e * scale.astype(epilogue_dtype)
                        + shift.astype(epilogue_dtype), 0.0)
        return h.astype(jnp.bfloat16)                        # MXU input (no-op if bf16)

    h = x_ref[...]                                           # (B, P) bf16
    y = jnp.dot(h, w_ref[0], preferred_element_type=jnp.float32)
    h = bn_relu(y, 0)
    y = jnp.dot(h, w_ref[1], preferred_element_type=jnp.float32)
    h = bn_relu(y, 1)
    y = jnp.dot(h, w_ref[2], preferred_element_type=jnp.float32)
    h = bn_relu(y, 2)
    # nn.Dropout(p=0.0) is the identity.
    y = jnp.dot(h, w_ref[3], preferred_element_type=jnp.float32)
    gb4 = gb_ref[3]
    o_ref[...] = y + gb4[0:1, :]                             # final linear bias


def init_params(key, input_dim, hidden_dim, num_classes):
    """Synthetic FC_rAFA parameters packed into two slabs, padded to 128 lanes.

    Weights are stored transposed as (in_features, out_features) in bf16 for
    the MXU.  Padded gamma columns are ZERO (not one) so dead lanes stay zero
    through the BN scale (scale = gamma * rsqrt(eps)).
    """
    dims = [(input_dim, hidden_dim), (hidden_dim, hidden_dim),
            (hidden_dim, hidden_dim), (hidden_dim, num_classes)]
    p = max(_pad_to(d, _LANE) for pair in dims for d in pair)

    w_slab, gb_slab = [], []
    for idx, (d_in, d_out) in enumerate(dims):
        key, kw, kb = jax.random.split(key, 3)
        bound = 1.0 / (float(d_in) ** 0.5)                   # PyTorch-style init bound
        w_t = jax.random.uniform(kw, (d_in, d_out), jnp.float32, -bound, bound)
        w_slab.append(jnp.pad(w_t, ((0, p - d_in), (0, p - d_out))))
        if idx < 3:
            # Linear bias omitted: canceled by BN's mean subtraction.
            gamma = jnp.pad(jnp.ones((d_out,), jnp.float32), (0, p - d_out))
            beta = jnp.zeros((p,), jnp.float32)
            gb_slab.append(jnp.stack([gamma, beta], axis=0))
        else:
            b = jax.random.uniform(kb, (d_out,), jnp.float32, -bound, bound)
            b = jnp.pad(b, (0, p - d_out))
            gb_slab.append(jnp.stack([b, jnp.zeros((p,), jnp.float32)], axis=0))

    return {
        "w": jnp.stack(w_slab, axis=0).astype(jnp.bfloat16),   # (4, P, P) bf16
        "gb": jnp.stack(gb_slab, axis=0),                      # (4, 2, P) f32
    }


@functools.partial(jax.jit, static_argnames=("num_classes", "epilogue_dtype"))
def _fc_rafa_forward_jit(params, x, num_classes, epilogue_dtype):
    b = x.shape[0]
    h = x.reshape(b, -1).astype(jnp.float32)
    din = h.shape[1]
    p = params["w"].shape[1]
    if p > din:
        h = jnp.pad(h, ((0, 0), (0, p - din)))
    h = h.astype(jnp.bfloat16)

    flops = 2 * b * p * p * 4                                 # four (B,P)x(P,P) matmuls
    bytes_accessed = (h.size * 2 + params["w"].size * 2
                      + params["gb"].size * 4 + b * p * 4)
    kernel = functools.partial(_fused_fc_rafa_kernel, epilogue_dtype=epilogue_dtype)

    logits_pad = pl.pallas_call(
        kernel,
        out_shape=jax.ShapeDtypeStruct((b, p), jnp.float32),
        in_specs=[pl.BlockSpec(memory_space=pltpu.MemorySpace.VMEM)] * 3,
        out_specs=pl.BlockSpec(memory_space=pltpu.MemorySpace.VMEM),
        cost_estimate=pl.CostEstimate(flops=flops, transcendentals=3 * p,
                                      bytes_accessed=bytes_accessed),
    )(h, params["w"], params["gb"])

    # Downstream consumers that tolerate padding (loss/argmax with masking)
    # should use `logits_pad` directly to stay lane-dense; slice only at the
    # module boundary to match the PyTorch forward's (B, num_classes).
    logits = logits_pad[:, :num_classes]
    return logits, None


def fc_rafa_forward(params, x, num_classes, gt=None):
    """Mirrors FC_rAFA.forward; `gt` only feeds the (unimplemented) feedback-
    alignment backward path and has no effect on the forward computation."""
    return _fc_rafa_forward_jit(params, x, num_classes, _epilogue_dtype())


if __name__ == "__main__":
    # Small, forward-consistent shapes: x is (B, C, H, W) = (8, 4, 4, 4),
    # flattened to input_dim = 64; hidden_dim = 32; num_classes = 10.
    batch, channels, spatial = 8, 4, 4
    input_dim = channels * spatial * spatial      # 64
    hidden_dim = 32
    num_classes = 10

    key = jax.random.PRNGKey(0)
    kx, kp = jax.random.split(key)
    x = jax.random.normal(kx, (batch, channels, spatial, spatial), jnp.float32)

    params = init_params(kp, input_dim, hidden_dim, num_classes)

    logits, aux = fc_rafa_forward(params, x, num_classes=num_classes)
    logits = jax.block_until_ready(logits)
    assert logits.shape == (batch, num_classes)
    assert aux is None
    print("KERNEL_OK")
</pallas_src>

<mosaic_0001>
module attributes {stable_mosaic.version = 11 : i64} {
  func.func @_fused_fc_rafa_kernel(%arg0: memref<8x128xbf16, #tpu.memory_space<vmem>>, %arg1: memref<4x128x128xbf16, #tpu.memory_space<vmem>>, %arg2: memref<4x2x128xf32, #tpu.memory_space<vmem>>, %arg3: memref<8x128xf32, #tpu.memory_space<vmem>>) attributes {dimension_semantics = [], scalar_prefetch = 0 : i64, scratch_operands = 0 : i64, tpu.core_type = #tpu.core_type<tc>} {
    %c0 = arith.constant 0 : index
    %c0_0 = arith.constant 0 : index
    %0 = vector.load %arg0[%c0, %c0_0] : memref<8x128xbf16, #tpu.memory_space<vmem>>, vector<8x128xbf16>
    %c0_1 = arith.constant 0 : index
    %c0_2 = arith.constant 0 : index
    %c0_3 = arith.constant 0 : index
    %1 = vector.load %arg1[%c0_1, %c0_2, %c0_3] : memref<4x128x128xbf16, #tpu.memory_space<vmem>>, vector<1x128x128xbf16>
    %2 = vector.shape_cast %1 : vector<1x128x128xbf16> to vector<128x128xbf16>
    %cst = arith.constant dense<0.000000e+00> : vector<8x128xf32>
    %3 = tpu.matmul %0, %2, %cst {dimension_numbers = #tpu.dot_dimension_numbers<[1], [0], [0], [1], [0, 0, 1, 1], [], []>} : vector<8x128xbf16>, vector<128x128xbf16>, vector<8x128xf32> -> vector<8x128xf32>
    %c0_4 = arith.constant 0 : index
    %c0_5 = arith.constant 0 : index
    %c0_6 = arith.constant 0 : index
    %4 = vector.load %arg2[%c0_4, %c0_5, %c0_6] : memref<4x2x128xf32, #tpu.memory_space<vmem>>, vector<1x2x128xf32>
    %5 = vector.shape_cast %4 : vector<1x2x128xf32> to vector<2x128xf32>
    %6 = vector.extract_strided_slice %5 {offsets = [0, 0], sizes = [1, 128], strides = [1, 1]} : vector<2x128xf32> to vector<1x128xf32>
    %7 = vector.extract_strided_slice %5 {offsets = [1, 0], sizes = [1, 128], strides = [1, 1]} : vector<2x128xf32> to vector<1x128xf32>
    %cst_7 = arith.constant dense<0.000000e+00> : vector<128xf32>
    %8 = vector.multi_reduction <add>, %3, %cst_7 [0] : vector<8x128xf32> to vector<128xf32>
    %9 = vector.shape_cast %8 : vector<128xf32> to vector<1x128xf32>
    %cst_8 = arith.constant 1.250000e-01 : f32
    %10 = vector.broadcast %cst_8 : f32 to vector<1x128xf32>
    %11 = arith.mulf %9, %10 : vector<1x128xf32>
    %12 = arith.mulf %3, %3 : vector<8x128xf32>
    %cst_9 = arith.constant dense<0.000000e+00> : vector<128xf32>
    %13 = vector.multi_reduction <add>, %12, %cst_9 [0] : vector<8x128xf32> to vector<128xf32>
    %14 = vector.shape_cast %13 : vector<128xf32> to vector<1x128xf32>
    %cst_10 = arith.constant 1.250000e-01 : f32
    %15 = vector.broadcast %cst_10 : f32 to vector<1x128xf32>
    %16 = arith.mulf %14, %15 : vector<1x128xf32>
    %17 = arith.mulf %11, %11 : vector<1x128xf32>
    %18 = arith.subf %16, %17 : vector<1x128xf32>
    %cst_11 = arith.constant 9.99999974E-6 : f32
    %19 = vector.broadcast %cst_11 : f32 to vector<1x128xf32>
    %20 = arith.addf %18, %19 : vector<1x128xf32>
    %21 = math.rsqrt %20 : vector<1x128xf32>
    %22 = arith.mulf %6, %21 : vector<1x128xf32>
    %23 = arith.mulf %11, %22 : vector<1x128xf32>
    %24 = arith.subf %7, %23 : vector<1x128xf32>
    %25 = vector.broadcast %22 : vector<1x128xf32> to vector<8x128xf32>
    %26 = arith.mulf %3, %25 : vector<8x128xf32>
    %27 = vector.broadcast %24 : vector<1x128xf32> to vector<8x128xf32>
    %28 = arith.addf %26, %27 : vector<8x128xf32>
    %cst_12 = arith.constant 0.000000e+00 : f32
    %29 = vector.broadcast %cst_12 : f32 to vector<8x128xf32>
    %30 = arith.maximumf %28, %29 : vector<8x128xf32>
    %31 = arith.truncf %30 : vector<8x128xf32> to vector<8x128xbf16>
    %c1 = arith.constant 1 : index
    %c0_13 = arith.constant 0 : index
    %c0_14 = arith.constant 0 : index
    %32 = vector.load %arg1[%c1, %c0_13, %c0_14] : memref<4x128x128xbf16, #tpu.memory_space<vmem>>, vector<1x128x128xbf16>
    %33 = vector.shape_cast %32 : vector<1x128x128xbf16> to vector<128x128xbf16>
    %cst_15 = arith.constant dense<0.000000e+00> : vector<8x128xf32>
    %34 = tpu.matmul %31, %33, %cst_15 {dimension_numbers = #tpu.dot_dimension_numbers<[1], [0], [0], [1], [0, 0, 1, 1], [], []>} : vector<8x128xbf16>, vector<128x128xbf16>, vector<8x128xf32> -> vector<8x128xf32>
    %c1_16 = arith.constant 1 : index
    %c0_17 = arith.constant 0 : index
    %c0_18 = arith.constant 0 : index
    %35 = vector.load %arg2[%c1_16, %c0_17, %c0_18] : memref<4x2x128xf32, #tpu.memory_space<vmem>>, vector<1x2x128xf32>
    %36 = vector.shape_cast %35 : vector<1x2x128xf32> to vector<2x128xf32>
    %37 = vector.extract_strided_slice %36 {offsets = [0, 0], sizes = [1, 128], strides = [1, 1]} : vector<2x128xf32> to vector<1x128xf32>
    %38 = vector.extract_strided_slice %36 {offsets = [1, 0], sizes = [1, 128], strides = [1, 1]} : vector<2x128xf32> to vector<1x128xf32>
    %cst_19 = arith.constant dense<0.000000e+00> : vector<128xf32>
    %39 = vector.multi_reduction <add>, %34, %cst_19 [0] : vector<8x128xf32> to vector<128xf32>
    %40 = vector.shape_cast %39 : vector<128xf32> to vector<1x128xf32>
    %cst_20 = arith.constant 1.250000e-01 : f32
    %41 = vector.broadcast %cst_20 : f32 to vector<1x128xf32>
    %42 = arith.mulf %40, %41 : vector<1x128xf32>
    %43 = arith.mulf %34, %34 : vector<8x128xf32>
    %cst_21 = arith.constant dense<0.000000e+00> : vector<128xf32>
    %44 = vector.multi_reduction <add>, %43, %cst_21 [0] : vector<8x128xf32> to vector<128xf32>
    %45 = vector.shape_cast %44 : vector<128xf32> to vector<1x128xf32>
    %cst_22 = arith.constant 1.250000e-01 : f32
    %46 = vector.broadcast %cst_22 : f32 to vector<1x128xf32>
    %47 = arith.mulf %45, %46 : vector<1x128xf32>
    %48 = arith.mulf %42, %42 : vector<1x128xf32>
    %49 = arith.subf %47, %48 : vector<1x128xf32>
    %cst_23 = arith.constant 9.99999974E-6 : f32
    %50 = vector.broadcast %cst_23 : f32 to vector<1x128xf32>
    %51 = arith.addf %49, %50 : vector<1x128xf32>
    %52 = math.rsqrt %51 : vector<1x128xf32>
    %53 = arith.mulf %37, %52 : vector<1x128xf32>
    %54 = arith.mulf %42, %53 : vector<1x128xf32>
    %55 = arith.subf %38, %54 : vector<1x128xf32>
    %56 = vector.broadcast %53 : vector<1x128xf32> to vector<8x128xf32>
    %57 = arith.mulf %34, %56 : vector<8x128xf32>
    %58 = vector.broadcast %55 : vector<1x128xf32> to vector<8x128xf32>
    %59 = arith.addf %57, %58 : vector<8x128xf32>
    %cst_24 = arith.constant 0.000000e+00 : f32
    %60 = vector.broadcast %cst_24 : f32 to vector<8x128xf32>
    %61 = arith.maximumf %59, %60 : vector<8x128xf32>
    %62 = arith.truncf %61 : vector<8x128xf32> to vector<8x128xbf16>
    %c2 = arith.constant 2 : index
    %c0_25 = arith.constant 0 : index
    %c0_26 = arith.constant 0 : index
    %63 = vector.load %arg1[%c2, %c0_25, %c0_26] : memref<4x128x128xbf16, #tpu.memory_space<vmem>>, vector<1x128x128xbf16>
    %64 = vector.shape_cast %63 : vector<1x128x128xbf16> to vector<128x128xbf16>
    %cst_27 = arith.constant dense<0.000000e+00> : vector<8x128xf32>
    %65 = tpu.matmul %62, %64, %cst_27 {dimension_numbers = #tpu.dot_dimension_numbers<[1], [0], [0], [1], [0, 0, 1, 1], [], []>} : vector<8x128xbf16>, vector<128x128xbf16>, vector<8x128xf32> -> vector<8x128xf32>
    %c2_28 = arith.constant 2 : index
    %c0_29 = arith.constant 0 : index
    %c0_30 = arith.constant 0 : index
    %66 = vector.load %arg2[%c2_28, %c0_29, %c0_30] : memref<4x2x128xf32, #tpu.memory_space<vmem>>, vector<1x2x128xf32>
    %67 = vector.shape_cast %66 : vector<1x2x128xf32> to vector<2x128xf32>
    %68 = vector.extract_strided_slice %67 {offsets = [0, 0], sizes = [1, 128], strides = [1, 1]} : vector<2x128xf32> to vector<1x128xf32>
    %69 = vector.extract_strided_slice %67 {offsets = [1, 0], sizes = [1, 128], strides = [1, 1]} : vector<2x128xf32> to vector<1x128xf32>
    %cst_31 = arith.constant dense<0.000000e+00> : vector<128xf32>
    %70 = vector.multi_reduction <add>, %65, %cst_31 [0] : vector<8x128xf32> to vector<128xf32>
    %71 = vector.shape_cast %70 : vector<128xf32> to vector<1x128xf32>
    %cst_32 = arith.constant 1.250000e-01 : f32
    %72 = vector.broadcast %cst_32 : f32 to vector<1x128xf32>
    %73 = arith.mulf %71, %72 : vector<1x128xf32>
    %74 = arith.mulf %65, %65 : vector<8x128xf32>
    %cst_33 = arith.constant dense<0.000000e+00> : vector<128xf32>
    %75 = vector.multi_reduction <add>, %74, %cst_33 [0] : vector<8x128xf32> to vector<128xf32>
    %76 = vector.shape_cast %75 : vector<128xf32> to vector<1x128xf32>
    %cst_34 = arith.constant 1.250000e-01 : f32
    %77 = vector.broadcast %cst_34 : f32 to vector<1x128xf32>
    %78 = arith.mulf %76, %77 : vector<1x128xf32>
    %79 = arith.mulf %73, %73 : vector<1x128xf32>
    %80 = arith.subf %78, %79 : vector<1x128xf32>
    %cst_35 = arith.constant 9.99999974E-6 : f32
    %81 = vector.broadcast %cst_35 : f32 to vector<1x128xf32>
    %82 = arith.addf %80, %81 : vector<1x128xf32>
    %83 = math.rsqrt %82 : vector<1x128xf32>
    %84 = arith.mulf %68, %83 : vector<1x128xf32>
    %85 = arith.mulf %73, %84 : vector<1x128xf32>
    %86 = arith.subf %69, %85 : vector<1x128xf32>
    %87 = vector.broadcast %84 : vector<1x128xf32> to vector<8x128xf32>
    %88 = arith.mulf %65, %87 : vector<8x128xf32>
    %89 = vector.broadcast %86 : vector<1x128xf32> to vector<8x128xf32>
    %90 = arith.addf %88, %89 : vector<8x128xf32>
    %cst_36 = arith.constant 0.000000e+00 : f32
    %91 = vector.broadcast %cst_36 : f32 to vector<8x128xf32>
    %92 = arith.maximumf %90, %91 : vector<8x128xf32>
    %93 = arith.truncf %92 : vector<8x128xf32> to vector<8x128xbf16>
    %c3 = arith.constant 3 : index
    %c0_37 = arith.constant 0 : index
    %c0_38 = arith.constant 0 : index
    %94 = vector.load %arg1[%c3, %c0_37, %c0_38] : memref<4x128x128xbf16, #tpu.memory_space<vmem>>, vector<1x128x128xbf16>
    %95 = vector.shape_cast %94 : vector<1x128x128xbf16> to vector<128x128xbf16>
    %cst_39 = arith.constant dense<0.000000e+00> : vector<8x128xf32>
    %96 = tpu.matmul %93, %95, %cst_39 {dimension_numbers = #tpu.dot_dimension_numbers<[1], [0], [0], [1], [0, 0, 1, 1], [], []>} : vector<8x128xbf16>, vector<128x128xbf16>, vector<8x128xf32> -> vector<8x128xf32>
    %c3_40 = arith.constant 3 : index
    %c0_41 = arith.constant 0 : index
    %c0_42 = arith.constant 0 : index
    %97 = vector.load %arg2[%c3_40, %c0_41, %c0_42] : memref<4x2x128xf32, #tpu.memory_space<vmem>>, vector<1x2x128xf32>
    %98 = vector.shape_cast %97 : vector<1x2x128xf32> to vector<2x128xf32>
    %99 = vector.extract_strided_slice %98 {offsets = [0, 0], sizes = [1, 128], strides = [1, 1]} : vector<2x128xf32> to vector<1x128xf32>
    %100 = vector.broadcast %99 : vector<1x128xf32> to vector<8x128xf32>
    %101 = arith.addf %96, %100 : vector<8x128xf32>
    %c0_43 = arith.constant 0 : index
    %c0_44 = arith.constant 0 : index
    %102 = vector.load %arg3[%c0_43, %c0_44] : memref<8x128xf32, #tpu.memory_space<vmem>>, vector<8x128xf32>
    tpu.vector_store %arg3[%c0_43, %c0_44], %101 {strides = array<i32>} : memref<8x128xf32, #tpu.memory_space<vmem>>, vector<8x128xf32>,
    return
  }
}

</mosaic_0001>

<bundles_post_ra>
// kernel: _fc_rafa_forward_jit.1
= control target key start
LH: loop header
LB: loop body
LE: loop exit
PB: predicated region body
PF: predicated region fallthrough
CT: control target
= control target key end

     0   :  { %8 = vsyncpa [#allocation3], 0  ;;  %s925_s0 = inlined_call_operand.vmem [shape: bf16[8,128], index: 0, kind: input, shape index: {}]   ;;  %s926_s1 = inlined_call_operand.hbm [shape: bf16[4,128,128], index: 1, kind: input, shape index: {}]   ;;  %s927_s2 = inlined_call_operand.vmem [shape: f32[4,2,128], index: 2, kind: input, shape index: {}]   ;;  %s928_s3 = inlined_call_operand.hbm [shape: f32[8,128], index: 3, kind: output, shape index: {}]  }
   0x1   :  { %9 = vsyncpa [#allocation4], 0  ;;  %s827_s12 = smov [#allocation2]  }
   0x2   :  { %s17_s13 = sshll.u32 %s827_s12, 4  ;;  %s18_s13 = int_to_ptr.vmem [resolvable:$true] %s17_s13 }
   0x3   :  { %s791_s14 = scalar_lea.vmem %s18_s13, 4096  ;;  %p796_p1 = scmp.lt.s32.totalorder %s18_s13, %s18_s13 }
   0x4   :  { %p792_p0 = scmp.ne.s32.totalorder %s18_s13, %s791_s14  ;;  %p797_p2 = scmp.lt.s32.totalorder %s791_s14, %s791_s14 }
   0x6   :  { %p798_p3 = por %p797_p2, %p796_p1 }
   0x8   :  { %p799_p4 = pnand %p798_p3, %p792_p0 }
   0xa   :  { %802 = shalt.err (!%p799_p4)
}
   0xb   :  { %s828_s15 = smov 64   ;;  %s829_s16 = smov 4  }
   0xc   :  { %23 = dma.hbm_to_vmem [thread:$0]  %s926_s1, 4096, %s18_s13, [#allocation3], %s828_s15, %s828_s15, %s829_s16  }
   0xd   :  { %823 = dma.done.wait [#allocation3], 4096  }
   0xe   :  { %824 = vsyncadd [#allocation3], 4294963200  ;;  %v830_v0 = vmov 0.0   ;;  %vm831_vm0 = vmmov 0   ;;  %v745_v1 = vld [vmem:[#allocation2 + $0x38] sm:$0xff]   ;;  %v746_v2 = vld [vmem:[#allocation2 + $0x30] sm:$0xff]   ;;  %v161_v40 = vlaneseq }
   0xf   :  { %659 = vmatprep.subr.bf16.mxu0 %v830_v0  ;;  %675 = vmatprep.mubr.msk.bf16.mxu0 %vm831_vm0, %v830_v0  ;;  %v747_v3 = vld [vmem:[#allocation2 + $0x28] sm:$0xff]   ;;  %v748_v4 = vld [vmem:[#allocation2 + $0x20] sm:$0xff]   ;;  %v749_v5 = vld [vmem:[#allocation2 + $0x18] sm:$0xff]   ;;  %s832_s27 = smov [#allocation5]  }
  0x10   :  { %679 = vmatprep.subr.bf16.mxu1 %v830_v0  ;;  %695 = vmatprep.mubr.msk.bf16.mxu1 %vm831_vm0, %v830_v0  ;;  %v750_v6 = vld [vmem:[#allocation2 + $0x10] sm:$0xff]   ;;  %v751_v7 = vld [vmem:[#allocation2 + $0x8] sm:$0xff]   ;;  %v752_v8 = vld [vmem:[#allocation2] sm:$0xff]   ;;  %v162_v41 = vshrl.u32 %v161_v40, 7  ;;  %s579_s28 = sshll.u32 %s832_s27, 4  ;;  %s580_s28 = int_to_ptr.vmem [resolvable:$true] %s579_s28 }
  0x11   :  { %660 = vmatpush3.bf16.msra.mxu0 %v745_v1  ;;  %v30_v9 = vld [vmem:[%s925_s0] sm:$0xf]  ;;  %v753_v10 = vld [vmem:[#allocation2 + $0x78] sm:$0xff]   ;;  %v754_v11 = vld [vmem:[#allocation2 + $0x70] sm:$0xff]   ;;  %s803_s29 = scalar_lea.vmem %s580_s28, 128  ;;  %p808_p6 = scmp.lt.s32.totalorder %s580_s28, %s580_s28 }
  0x12   :  { %661 = vmatprep.subr.bf16.mxu0 %v830_v0  ;;  %680 = vmatpush3.bf16.msra.mxu1 %v753_v10  ;;  %v755_v12 = vld [vmem:[#allocation2 + $0x68] sm:$0xff]   ;;  %v756_v13 = vld [vmem:[#allocation2 + $0x60] sm:$0xff]   ;;  %v757_v14 = vld [vmem:[#allocation2 + $0x58] sm:$0xff]   ;;  %v886_v45 = vsub.s32 0, %v162_v41  ;;  %v889_v49 = vsub.s32 1, %v162_v41  ;;  %p804_p5 = scmp.ne.s32.totalorder %s580_s28, %s803_s29  ;;  %p809_p7 = scmp.lt.s32.totalorder %s803_s29, %s803_s29 }
  0x13   :  { %681 = vmatprep.subr.bf16.mxu1 %v830_v0  ;;  %v758_v15 = vld [vmem:[#allocation2 + $0x50] sm:$0xff]   ;;  %v759_v16 = vld [vmem:[#allocation2 + $0x48] sm:$0xff]   ;;  %v760_v17 = vld [vmem:[#allocation2 + $0x40] sm:$0xff]  }
  0x14   :  { %v135_v42 = vld [vmem:[%s927_s2] sm:$0x3]  ;;  %v761_v56 = vld [vmem:[#allocation2 + $0xb8] sm:$0xff]   ;;  %v762_v57 = vld [vmem:[#allocation2 + $0xb0] sm:$0xff]   ;;  %p810_p8 = por %p809_p7, %p808_p6 }
  0x15   :  { %662 = vmatpush3.bf16.msra.mxu0 %v746_v2  ;;  %v763_v58 = vld [vmem:[#allocation2 + $0xa8] sm:$0xff]   ;;  %v764_v59 = vld [vmem:[#allocation2 + $0xa0] sm:$0xff]   ;;  %v765_v60 = vld [vmem:[#allocation2 + $0x98] sm:$0xff]  }
  0x16   :  { %663 = vmatprep.subr.bf16.mxu0 %v830_v0  ;;  %682 = vmatpush3.bf16.msra.mxu1 %v754_v11  ;;  %v766_v61 = vld [vmem:[#allocation2 + $0x90] sm:$0xff]   ;;  %v767_v62 = vld [vmem:[#allocation2 + $0x88] sm:$0xff]   ;;  %v768_v63 = vld [vmem:[#allocation2 + $0x80] sm:$0xff]   ;;  %p811_p9 = pnand %p810_p8, %p804_p5 }
  0x17   :  { %683 = vmatprep.subr.bf16.mxu1 %v830_v0  ;;  %v774_v40 = vld [vmem:[#allocation2 + $0xd0] sm:$0xff]   ;;  %v775_v41 = vld [vmem:[#allocation2 + $0xc8] sm:$0xff]  }
  0x19   :  { %664 = vmatpush3.bf16.msra.mxu0 %v747_v3 }
  0x1a   :  { %665 = vmatprep.subr.bf16.mxu0 %v830_v0  ;;  %684 = vmatpush3.bf16.msra.mxu1 %v755_v12 }
  0x1b   :  { %685 = vmatprep.subr.bf16.mxu1 %v830_v0 }
  0x1d   :  { %666 = vmatpush3.bf16.msra.mxu0 %v748_v4 }
  0x1e   :  { %667 = vmatprep.subr.bf16.mxu0 %v830_v0  ;;  %686 = vmatpush3.bf16.msra.mxu1 %v756_v13 }
  0x1f   :  { %687 = vmatprep.subr.bf16.mxu1 %v830_v0 }
  0x21   :  { %668 = vmatpush3.bf16.msra.mxu0 %v749_v5 }
  0x22   :  { %669 = vmatprep.subr.bf16.mxu0 %v830_v0  ;;  %688 = vmatpush3.bf16.msra.mxu1 %v757_v14 }
  0x23   :  { %689 = vmatprep.subr.bf16.mxu1 %v830_v0 }
  0x25   :  { %670 = vmatpush3.bf16.msra.mxu0 %v750_v6 }
  0x26   :  { %671 = vmatprep.subr.bf16.mxu0 %v830_v0  ;;  %690 = vmatpush3.bf16.msra.mxu1 %v758_v15 }
  0x27   :  { %691 = vmatprep.subr.bf16.mxu1 %v830_v0 }
  0x29   :  { %672 = vmatpush3.bf16.msra.mxu0 %v751_v7 }
  0x2a   :  { %673 = vmatprep.subr.bf16.mxu0 %v830_v0  ;;  %692 = vmatpush3.bf16.msra.mxu1 %v759_v16 }
  0x2b   :  { %693 = vmatprep.subr.bf16.mxu1 %v830_v0 }
  0x2d   :  { %674 = vmatpush3.bf16.msra.mxu0 %v752_v8 }
  0x2e   :  { %699 = vmatprep.subr.bf16.mxu0 %v830_v0  ;;  %694 = vmatpush3.bf16.msra.mxu1 %v760_v17 }
  0x2f   :  { %719 = vmatprep.subr.bf16.mxu1 %v830_v0 }
  0x30   :  { %676 = vmatmul.mubr.bf16.vlgmr.msra.gmra.mxu0 %v30_v9 }
  0x31   :  { %715 = vmatprep.mubr.msk.bf16.mxu0 %vm831_vm0, %v830_v0  ;;  %700 = vmatpush3.bf16.msra.mxu0 %v761_v56 }
  0x32   :  { %701 = vmatprep.subr.bf16.mxu0 %v830_v0 }
  0x35   :  { %702 = vmatpush3.bf16.msra.mxu0 %v762_v57 }
  0x36   :  { %703 = vmatprep.subr.bf16.mxu0 %v830_v0 }
  0x39   :  { %704 = vmatpush3.bf16.msra.mxu0 %v763_v58 }
  0x3a   :  { %705 = vmatprep.subr.bf16.mxu0 %v830_v0 }
  0x3d   :  { %706 = vmatpush3.bf16.msra.mxu0 %v764_v59 }
  0x3e   :  { %707 = vmatprep.subr.bf16.mxu0 %v830_v0 }
  0x41   :  { %708 = vmatpush3.bf16.msra.mxu0 %v765_v60 }
  0x42   :  { %709 = vmatprep.subr.bf16.mxu0 %v830_v0 }
  0x45   :  { %710 = vmatpush3.bf16.msra.mxu0 %v766_v61 }
  0x46   :  { %711 = vmatprep.subr.bf16.mxu0 %v830_v0 }
  0x49   :  { %712 = vmatpush3.bf16.msra.mxu0 %v767_v62 }
  0x4a   :  { %713 = vmatprep.subr.bf16.mxu0 %v830_v0 }
  0x4d   :  { %714 = vmatpush3.bf16.msra.mxu0 %v768_v63 }
  0xf0   :  { %v129_v18 = vpop.f32.mrf.mxu0 }
  0xf1   :  { %v136_v19 = vrot.slane %v129_v18, 4  ;;  %v143_v20 = vmul.f32 %v129_v18, %v129_v18 }
  0xf2   :  { %v677_v21 = vpop.f32.mrf.mxu0 }
  0xf3   :  { %v137_v22 = vadd.f32 %v136_v19, %v129_v18  ;;  %v144_v23 = vrot.slane %v143_v20, 4 }
  0xf4   :  { %v132_v24 = vpop.f32.mrf.mxu0 }
  0xf5   :  { %v138_v25 = vrot.slane %v137_v22, 2  ;;  %v145_v26 = vadd.f32 %v144_v23, %v143_v20  ;;  %v604_v23 = vld [vmem:[%s927_s2 + $0x2] sm:$0x3] }
  0xf6   :  { %v678_v27 = vpop.f32.mrf.mxu0 }
  0xf7   :  { %v139_v28 = vadd.f32 %v138_v25, %v137_v22  ;;  %v146_v29 = vrot.slane %v145_v26, 2 }
  0xf9   :  { %v140_v30 = vrot.slane %v139_v28, 1  ;;  %v147_v31 = vadd.f32 %v146_v29, %v145_v26 }
  0xfb   :  { %v141_v32 = vadd.f32 %v140_v30, %v139_v28  ;;  %v148_v33 = vrot.slane %v147_v31, 1 }
  0xfd   :  { %v142_v34 = vmul.f32 0.125, %v141_v32  ;;  %v149_v35 = vadd.f32 %v148_v33, %v147_v31 }
  0xff   :  { %v150_v36 = vmul.f32 0.125, %v149_v35  ;;  %v151_v37 = vmul.f32 %v142_v34, %v142_v34  ;;  %v769_v35 = vld [vmem:[#allocation2 + $0xf8] sm:$0xff]  }
 0x101   :  { %v152_v38 = vsub.f32 %v150_v36, %v151_v37  ;;  %v770_v36 = vld [vmem:[#allocation2 + $0xf0] sm:$0xff]   ;;  %v771_v37 = vld [vmem:[#allocation2 + $0xe8] sm:$0xff]  }
 0x103   :  { %v153_v39 = vadd.f32 1e-05, %v152_v38  ;;  %v772_v38 = vld [vmem:[#allocation2 + $0xe0] sm:$0xff]  }
 0x105   :  { %777 = vrsqrt.f32 %v153_v39  ;;  %v773_v39 = vld [vmem:[#allocation2 + $0xd8] sm:$0xff]  }
 0x112   :  { %v778_v43 = vpop.eup %777 }
 0x113   :  { %v155_v44 = vmul.f32 %v778_v43, %v135_v42 }
 0x115   :  { %v156_v46 = vmul.f32 %v155_v44, %v142_v34  ;;  %v164_v47 = vrot.slane %v155_v44, %v886_v45 }
 0x117   :  { %v158_v48 = vrot.slane %v156_v46, 7  ;;  %v165_v51 = vmul.f32 %v164_v47, %v129_v18 }
 0x119   :  { %v160_v50 = vsub.f32 %v135_v42, %v158_v48  ;;  %v776_v42 = vld [vmem:[#allocation2 + $0xc0] sm:$0xff]  }
 0x11b   :  { %v169_v52 = vrot.slane %v160_v50, %v889_v49 }
 0x11d   :  { %v170_v53 = vadd.f32 %v169_v52, %v165_v51 }
 0x11f   :  { %v171_v54 = vmax.f32 %v170_v53, 0.0 }
 0x121   :  { %v172_v55 = vpack.c.bf16 %v171_v54, %v171_v54 }
 0x123   :  { %696 = vmatmul.mubr.bf16.vlgmr.msra.gmra.mxu1 %v172_v55 }
 0x124   :  { %735 = vmatprep.mubr.msk.bf16.mxu1 %vm831_vm0, %v830_v0  ;;  %720 = vmatpush3.bf16.msra.mxu1 %v769_v35 }
 0x125   :  { %721 = vmatprep.subr.bf16.mxu1 %v830_v0 }
 0x128   :  { %722 = vmatpush3.bf16.msra.mxu1 %v770_v36 }
 0x129   :  { %723 = vmatprep.subr.bf16.mxu1 %v830_v0 }
 0x12c   :  { %724 = vmatpush3.bf16.msra.mxu1 %v771_v37 }
 0x12d   :  { %725 = vmatprep.subr.bf16.mxu1 %v830_v0 }
 0x130   :  { %726 = vmatpush3.bf16.msra.mxu1 %v772_v38 }
 0x131   :  { %727 = vmatprep.subr.bf16.mxu1 %v830_v0 }
 0x134   :  { %728 = vmatpush3.bf16.msra.mxu1 %v773_v39 }
 0x135   :  { %729 = vmatprep.subr.bf16.mxu1 %v830_v0 }
 0x138   :  { %730 = vmatpush3.bf16.msra.mxu1 %v774_v40 }
 0x139   :  { %731 = vmatprep.subr.bf16.mxu1 %v830_v0 }
 0x13c   :  { %732 = vmatpush3.bf16.msra.mxu1 %v775_v41 }
 0x13d   :  { %733 = vmatprep.subr.bf16.mxu1 %v830_v0 }
 0x140   :  { %734 = vmatpush3.bf16.msra.mxu1 %v776_v42 }
 0x1e3   :  { %v272_v1 = vpop.f32.mrf.mxu1 }
 0x1e4   :  { %v280_v2 = vrot.slane %v272_v1, 4  ;;  %v287_v3 = vmul.f32 %v272_v1, %v272_v1 }
 0x1e5   :  { %v697_v4 = vpop.f32.mrf.mxu1 }
 0x1e6   :  { %v281_v5 = vadd.f32 %v280_v2, %v272_v1  ;;  %v288_v6 = vrot.slane %v287_v3, 4 }
 0x1e7   :  { %v275_v7 = vpop.f32.mrf.mxu1 }
 0x1e8   :  { %v282_v8 = vrot.slane %v281_v5, 2  ;;  %v289_v9 = vadd.f32 %v288_v6, %v287_v3  ;;  %v613_v3 = vld [vmem:[%s927_s2 + $0x4] sm:$0x3] }
 0x1e9   :  { %v698_v10 = vpop.f32.mrf.mxu1 }
 0x1ea   :  { %v283_v11 = vadd.f32 %v282_v8, %v281_v5  ;;  %v290_v12 = vrot.slane %v289_v9, 2 }
 0x1ec   :  { %v284_v13 = vrot.slane %v283_v11, 1  ;;  %v291_v14 = vadd.f32 %v290_v12, %v289_v9 }
 0x1ee   :  { %v285_v15 = vadd.f32 %v284_v13, %v283_v11  ;;  %v292_v16 = vrot.slane %v291_v14, 1 }
 0x1f0   :  { %v286_v17 = vmul.f32 0.125, %v285_v15  ;;  %v293_v18 = vadd.f32 %v292_v16, %v291_v14  ;;  %v614_v15 = vld [vmem:[%s927_s2 + $0x6] sm:$0x3] }
 0x1f1   :  { %v483_v16 = vrot.slane %v614_v15, %v886_v45 }
 0x1f2   :  { %v294_v19 = vmul.f32 0.125, %v293_v18  ;;  %v295_v20 = vmul.f32 %v286_v17, %v286_v17 }
 0x1f4   :  { %v296_v21 = vsub.f32 %v294_v19, %v295_v20 }
 0x1f6   :  { %v297_v22 = vadd.f32 1e-05, %v296_v21 }
 0x1f8   :  { %779 = vrsqrt.f32 %v297_v22 }
 0x205   :  { %v780_v24 = vpop.eup %779 }
 0x206   :  { %v299_v25 = vmul.f32 %v780_v24, %v604_v23 }
 0x208   :  { %v300_v26 = vmul.f32 %v299_v25, %v286_v17  ;;  %v308_v28 = vrot.slane %v299_v25, %v886_v45 }
 0x20a   :  { %v302_v27 = vrot.slane %v300_v26, 7  ;;  %v309_v30 = vmul.f32 %v308_v28, %v272_v1 }
 0x20c   :  { %v304_v29 = vsub.f32 %v604_v23, %v302_v27 }
 0x20e   :  { %v313_v31 = vrot.slane %v304_v29, %v889_v49 }
 0x210   :  { %v314_v32 = vadd.f32 %v313_v31, %v309_v30 }
 0x212   :  { %v315_v33 = vmax.f32 %v314_v32, 0.0 }
 0x214   :  { %v316_v34 = vpack.c.bf16 %v315_v33, %v315_v33 }
 0x216   :  { %716 = vmatmul.mubr.bf16.vlgmr.msra.gmra.mxu0 %v316_v34 }
 0x2d6   :  { %v416_v43 = vpop.f32.mrf.mxu0 }
 0x2d7   :  { %v424_v44 = vrot.slane %v416_v43, 4  ;;  %v431_v46 = vmul.f32 %v416_v43, %v416_v43 }
 0x2d8   :  { %v717_v47 = vpop.f32.mrf.mxu0 }
 0x2d9   :  { %v425_v48 = vadd.f32 %v424_v44, %v416_v43  ;;  %v432_v50 = vrot.slane %v431_v46, 4 }
 0x2da   :  { %v419_v51 = vpop.f32.mrf.mxu0 }
 0x2db   :  { %v426_v52 = vrot.slane %v425_v48, 2  ;;  %v433_v53 = vadd.f32 %v432_v50, %v431_v46 }
 0x2dc   :  { %v718_v54 = vpop.f32.mrf.mxu0 }
 0x2dd   :  { %v427_v55 = vadd.f32 %v426_v52, %v425_v48  ;;  %v434_v56 = vrot.slane %v433_v53, 2 }
 0x2df   :  { %v428_v57 = vrot.slane %v427_v55, 1  ;;  %v435_v58 = vadd.f32 %v434_v56, %v433_v53 }
 0x2e1   :  { %v429_v59 = vadd.f32 %v428_v57, %v427_v55  ;;  %v436_v60 = vrot.slane %v435_v58, 1 }
 0x2e3   :  { %v430_v61 = vmul.f32 0.125, %v429_v59  ;;  %v437_v0 = vadd.f32 %v436_v60, %v435_v58 }
 0x2e5   :  { %v438_v62 = vmul.f32 0.125, %v437_v0  ;;  %v439_v63 = vmul.f32 %v430_v61, %v430_v61 }
 0x2e7   :  { %v440_v1 = vsub.f32 %v438_v62, %v439_v63 }
 0x2e9   :  { %v441_v2 = vadd.f32 1e-05, %v440_v1 }
 0x2eb   :  { %781 = vrsqrt.f32 %v441_v2 }
 0x2f8   :  { %v782_v4 = vpop.eup %781 }
 0x2f9   :  { %v443_v5 = vmul.f32 %v782_v4, %v613_v3 }
 0x2fb   :  { %v444_v6 = vmul.f32 %v443_v5, %v430_v61  ;;  %v452_v8 = vrot.slane %v443_v5, %v886_v45 }
 0x2fd   :  { %v446_v7 = vrot.slane %v444_v6, 7  ;;  %v453_v10 = vmul.f32 %v452_v8, %v416_v43 }
 0x2ff   :  { %v448_v9 = vsub.f32 %v613_v3, %v446_v7 }
 0x301   :  { %v457_v11 = vrot.slane %v448_v9, %v889_v49 }
 0x303   :  { %v458_v12 = vadd.f32 %v457_v11, %v453_v10 }
 0x305   :  { %v459_v13 = vmax.f32 %v458_v12, 0.0 }
 0x307   :  { %v460_v14 = vpack.c.bf16 %v459_v13, %v459_v13 }
 0x309   :  { %736 = vmatmul.mubr.bf16.vlgmr.msra.gmra.mxu1 %v460_v14 }
 0x3c9   :  { %v566_v17 = vpop.f32.mrf.mxu1 }
 0x3ca   :  { %v567_v18 = vadd.f32 %v566_v17, %v483_v16 }
 0x3cb   :  { %v737_v19 = vpop.f32.mrf.mxu1 }
 0x3cc   :  { %572 = vst [vmem:[#allocation5] sm:$0xff] %v567_v18 }
 0x3cd   :  { %v569_v20 = vpop.f32.mrf.mxu1 }
 0x3ce   :  { %814 = shalt.err (!%p811_p9)
}
 0x3cf   :  { %582 = dma.vmem_to_hbm [thread:$0]  %s580_s28, 128, %s928_s3, [#allocation4]   ;;  %v738_v45 = vpop.f32.mrf.mxu1 }
 0x3d0   :  { %825 = dma.done.wait [#allocation4], 128  }
 0x3d1   :  { %826 = vsyncadd [#allocation4], 4294967168 }
 0x3d2   :  { %586 = vsyncpa [#allocation3], 1 }
 0x3d3   :  { %587 = vsyncpa [#allocation4], 1 }

</bundles_post_ra>
